<compile_context>
chip_gen: v7x
topology: tpu7x:2x2x1
jax: 0.10.0
libtpu: 0.0.40
codegen_flags: <defaults>
</compile_context>

<pallas_src>
import functools

import jax
import jax.numpy as jnp
from jax.experimental import pallas as pl
from jax.experimental.pallas import tpu as pltpu

_LN_EPS = 1e-5   # nn.LayerNorm default
_SUBLANE = 8


def _round_up(x, m):
    return (x + m - 1) // m * m


def _layernorm(h, gamma, beta):
    # PyTorch LayerNorm (biased variance over the last dim).
    # E[h^2] - m^2 form: both cross-lane reductions are independent, so they
    # can issue back-to-back into the XLU FIFO.
    m = jnp.mean(h, axis=-1, keepdims=True)
    ms = jnp.mean(h * h, axis=-1, keepdims=True)
    v = ms - m * m
    return (h - m) * jax.lax.rsqrt(v + _LN_EPS) * gamma + beta


def ddpg_actor_kernel(x_ref,
                      w1_ref, p1_ref,
                      w2_ref, p2_ref,
                      wmu_ref, bmu_ref,
                      o_ref):
    # MXU operands in the prepared weight dtype (bf16 by default), f32
    # accumulation; all elementwise / LayerNorm / tanh math stays in f32.
    mxu_dtype = w1_ref.dtype
    x = x_ref[...].astype(mxu_dtype)

    # fc1 -> LayerNorm -> ReLU    (p1 rows: [bias, gamma, beta])
    p1 = p1_ref[...]
    h = jnp.dot(x, w1_ref[...], preferred_element_type=jnp.float32) + p1[0:1, :]
    h = _layernorm(h, p1[1:2, :], p1[2:3, :])
    h = jnp.maximum(h, 0.0)

    # fc2 -> LayerNorm -> ReLU
    p2 = p2_ref[...]
    h = jnp.dot(h.astype(mxu_dtype), w2_ref[...],
                preferred_element_type=jnp.float32) + p2[0:1, :]
    h = _layernorm(h, p2[1:2, :], p2[2:3, :])
    h = jnp.maximum(h, 0.0)

    # mu -> tanh (unpadded, narrow output: writeback is tiny)
    h = jnp.dot(h.astype(mxu_dtype), wmu_ref[...],
                preferred_element_type=jnp.float32) + bmu_ref[...]
    o_ref[...] = jnp.tanh(h).astype(o_ref.dtype)


def prepare_params(params, matmul_dtype=jnp.bfloat16):
    """One-time preprocessing (hoisted out of the hot forward path):
    cast weights to the MXU dtype and fuse (bias, gamma, beta) per layer."""
    return {
        "w1": params["w1"].astype(matmul_dtype),
        "p1": jnp.concatenate(
            [params["b1"], params["g1"], params["be1"]], axis=0),
        "w2": params["w2"].astype(matmul_dtype),
        "p2": jnp.concatenate(
            [params["b2"], params["g2"], params["be2"]], axis=0),
        "wmu": params["wmu"].astype(matmul_dtype),
        "bmu": params["bmu"],
    }


@functools.partial(jax.jit, static_argnames=("block_b", "out_dtype"))
def ddpg_actor_forward(state, prepared, *, block_b=4096, out_dtype=jnp.float32):
    """state: [B, input_dim] f32. prepared: output of prepare_params()."""
    b, in_dim = state.shape
    n_action = prepared["wmu"].shape[1]

    # --- batch tiling -------------------------------------------------------
    # Big tiles amortize the ~0.35 us per-grid-step overhead; but keep >= 2
    # grid steps when the batch allows so dimension_semantics=("parallel",)
    # actually shards across both v7x TensorCores.
    bt = _round_up(min(block_b, b), _SUBLANE)
    if b >= 2 * _SUBLANE:
        bt = min(bt, _round_up(-(-b // 2), _SUBLANE))
    b_pad = _round_up(b, bt)
    x = state if b_pad == b else jnp.pad(state, ((0, b_pad - b), (0, 0)))

    operands = (x,
                prepared["w1"], prepared["p1"],
                prepared["w2"], prepared["p2"],
                prepared["wmu"], prepared["bmu"])

    # Weights / fused params: full block, constant index_map -> resident in
    # VMEM, no re-DMA per batch tile.
    def const_spec(a):
        return pl.BlockSpec(a.shape, lambda i: (0, 0))

    grid = (b_pad // bt,)
    out = pl.pallas_call(
        ddpg_actor_kernel,
        out_shape=jax.ShapeDtypeStruct((b_pad, n_action), out_dtype),
        grid=grid,
        in_specs=[pl.BlockSpec((bt, in_dim), lambda i: (i, 0))]
                 + [const_spec(a) for a in operands[1:]],
        # Unpadded, narrow output block (full last dim) -> 16x less HBM
        # writeback than a 128-lane padded f32 slab.
        out_specs=pl.BlockSpec((bt, n_action), lambda i: (i, 0)),
        compiler_params=pltpu.CompilerParams(
            dimension_semantics=("parallel",)),   # megacore on v7x
    )(*operands)

    return out[:b]


def init_params(key, input_dim, fc1_dim, fc2_dim, n_action):
    """Deterministic init mirroring the PyTorch module's __init__ ranges."""
    ks = jax.random.split(key, 6)
    # The torch code uses weight.size()[0] (= out_features) for the fan term;
    # reproduce that faithfully.
    f1 = 1.0 / jnp.sqrt(jnp.float32(fc1_dim))
    f2 = 1.0 / jnp.sqrt(jnp.float32(fc2_dim))
    f3 = 0.003

    def u(k, shape, bound):
        return jax.random.uniform(k, shape, jnp.float32, -bound, bound)

    return {
        # stored as [in, out] (transposed vs torch's [out, in])
        "w1": u(ks[0], (input_dim, fc1_dim), f1),
        "b1": u(ks[1], (1, fc1_dim), f1),
        "g1": jnp.ones((1, fc1_dim), jnp.float32),   # LayerNorm defaults
        "be1": jnp.zeros((1, fc1_dim), jnp.float32),
        "w2": u(ks[2], (fc1_dim, fc2_dim), f2),
        "b2": u(ks[3], (1, fc2_dim), f2),
        "g2": jnp.ones((1, fc2_dim), jnp.float32),
        "be2": jnp.zeros((1, fc2_dim), jnp.float32),
        "wmu": u(ks[4], (fc2_dim, n_action), f3),
        "bmu": u(ks[5], (1, n_action), f3),
    }


def reference_forward(state, params):
    """Pure-JAX f32 reference (mirrors the PyTorch forward)."""
    h = state @ params["w1"] + params["b1"]
    m = h.mean(-1, keepdims=True)
    v = ((h - m) ** 2).mean(-1, keepdims=True)
    h = (h - m) / jnp.sqrt(v + _LN_EPS) * params["g1"] + params["be1"]
    h = jnp.maximum(h, 0.0)
    h = h @ params["w2"] + params["b2"]
    m = h.mean(-1, keepdims=True)
    v = ((h - m) ** 2).mean(-1, keepdims=True)
    h = (h - m) / jnp.sqrt(v + _LN_EPS) * params["g2"] + params["be2"]
    h = jnp.maximum(h, 0.0)
    return jnp.tanh(h @ params["wmu"] + params["bmu"])


# TODO(synk): the Adam optimiser and checkpoint save/load from the PyTorch
# module are host-side training/IO concerns with no Pallas equivalent; only
# the forward pass is implemented here.

if __name__ == "__main__":
    key = jax.random.PRNGKey(0)
    k_param, k_state, k_state2 = jax.random.split(key, 3)

    input_dim, fc1_dim, fc2_dim, n_action = 32, 64, 64, 8
    params = init_params(k_param, input_dim, fc1_dim, fc2_dim, n_action)

    # One-time weight preprocessing (hoisted out of the hot path).
    prep_f32 = prepare_params(params, matmul_dtype=jnp.float32)
    prep_bf16 = prepare_params(params, matmul_dtype=jnp.bfloat16)

    # Small batch (single grid step).
    batch = 4
    state = jax.random.normal(k_state, (batch, input_dim), jnp.float32)
    ref = reference_forward(state, params)

    # Exact-semantics f32 path.
    out_f32 = jax.block_until_ready(ddpg_actor_forward(state, prep_f32))
    assert out_f32.shape == (batch, n_action)
    assert jnp.all(jnp.abs(out_f32) <= 1.0 + 1e-6)
    assert jnp.allclose(out_f32, ref, atol=2e-5, rtol=1e-5)

    # Default bf16-MXU path (f32 accumulation + f32 elementwise).
    out_bf16 = jax.block_until_ready(ddpg_actor_forward(state, prep_bf16))
    assert out_bf16.shape == (batch, n_action)
    assert jnp.allclose(out_bf16, ref, atol=5e-2, rtol=0.0)

    # Larger, non-tile-aligned batch: exercises grid > 1, padding, pipelining,
    # and the >=2-grid-step megacore rule.
    batch2 = 300
    state2 = jax.random.normal(k_state2, (batch2, input_dim), jnp.float32)
    ref2 = reference_forward(state2, params)
    out2 = jax.block_until_ready(
        ddpg_actor_forward(state2, prep_f32, block_b=128))
    assert out2.shape == (batch2, n_action)
    assert jnp.all(jnp.abs(out2) <= 1.0 + 1e-6)
    assert jnp.allclose(out2, ref2, atol=2e-5, rtol=1e-5)

    print("KERNEL_OK")
</pallas_src>

<mosaic_0001>
module attributes {stable_mosaic.version = 11 : i64} {
  func.func @ddpg_actor_kernel(%arg0: i32, %arg1: memref<8x32xf32, #tpu.memory_space<vmem>>, %arg2: memref<32x64xf32, #tpu.memory_space<vmem>>, %arg3: memref<3x64xf32, #tpu.memory_space<vmem>>, %arg4: memref<64x64xf32, #tpu.memory_space<vmem>>, %arg5: memref<3x64xf32, #tpu.memory_space<vmem>>, %arg6: memref<64x8xf32, #tpu.memory_space<vmem>>, %arg7: memref<1x8xf32, #tpu.memory_space<vmem>>, %arg8: memref<8x8xf32, #tpu.memory_space<vmem>>) attributes {dimension_semantics = [#tpu.dimension_semantics<parallel>], iteration_bounds = array<i64: 1>, scalar_prefetch = 0 : i64, scratch_operands = 0 : i64, tpu.core_type = #tpu.core_type<tc>, window_params = [{transform_indices = @transform_0, window_bounds = array<i64: 8, 32>}, {pipeline_mode = #tpu.pipeline_mode<synchronous>, transform_indices = @transform_1, window_bounds = array<i64: 32, 64>}, {pipeline_mode = #tpu.pipeline_mode<synchronous>, transform_indices = @transform_2, window_bounds = array<i64: 3, 64>}, {pipeline_mode = #tpu.pipeline_mode<synchronous>, transform_indices = @transform_3, window_bounds = array<i64: 64, 64>}, {pipeline_mode = #tpu.pipeline_mode<synchronous>, transform_indices = @transform_4, window_bounds = array<i64: 3, 64>}, {pipeline_mode = #tpu.pipeline_mode<synchronous>, transform_indices = @transform_5, window_bounds = array<i64: 64, 8>}, {pipeline_mode = #tpu.pipeline_mode<synchronous>, transform_indices = @transform_6, window_bounds = array<i64: 1, 8>}, {transform_indices = @transform_7, window_bounds = array<i64: 8, 8>}]} {
    %c0 = arith.constant 0 : index
    %c0_0 = arith.constant 0 : index
    %0 = vector.load %arg1[%c0, %c0_0] : memref<8x32xf32, #tpu.memory_space<vmem>>, vector<8x32xf32>
    %c0_1 = arith.constant 0 : index
    %c0_2 = arith.constant 0 : index
    %1 = vector.load %arg3[%c0_1, %c0_2] : memref<3x64xf32, #tpu.memory_space<vmem>>, vector<3x64xf32>
    %c0_3 = arith.constant 0 : index
    %c0_4 = arith.constant 0 : index
    %2 = vector.load %arg2[%c0_3, %c0_4] : memref<32x64xf32, #tpu.memory_space<vmem>>, vector<32x64xf32>
    %cst = arith.constant dense<0.000000e+00> : vector<8x64xf32>
    %3 = tpu.matmul %0, %2, %cst {dimension_numbers = #tpu.dot_dimension_numbers<[1], [0], [0], [1], [0, 0, 1, 1], [], []>} : vector<8x32xf32>, vector<32x64xf32>, vector<8x64xf32> -> vector<8x64xf32>
    %4 = vector.extract_strided_slice %1 {offsets = [0, 0], sizes = [1, 64], strides = [1, 1]} : vector<3x64xf32> to vector<1x64xf32>
    %5 = vector.broadcast %4 : vector<1x64xf32> to vector<8x64xf32>
    %6 = arith.addf %3, %5 : vector<8x64xf32>
    %7 = vector.extract_strided_slice %1 {offsets = [1, 0], sizes = [1, 64], strides = [1, 1]} : vector<3x64xf32> to vector<1x64xf32>
    %8 = vector.extract_strided_slice %1 {offsets = [2, 0], sizes = [1, 64], strides = [1, 1]} : vector<3x64xf32> to vector<1x64xf32>
    %cst_5 = arith.constant dense<0.000000e+00> : vector<8xf32>
    %9 = vector.multi_reduction <add>, %6, %cst_5 [1] : vector<8x64xf32> to vector<8xf32>
    %10 = vector.shape_cast %9 : vector<8xf32> to vector<8x1xf32>
    %cst_6 = arith.constant 6.400000e+01 : f32
    %11 = vector.broadcast %cst_6 : f32 to vector<8x1xf32>
    %12 = arith.divf %10, %11 : vector<8x1xf32>
    %13 = arith.mulf %6, %6 : vector<8x64xf32>
    %cst_7 = arith.constant dense<0.000000e+00> : vector<8xf32>
    %14 = vector.multi_reduction <add>, %13, %cst_7 [1] : vector<8x64xf32> to vector<8xf32>
    %15 = vector.shape_cast %14 : vector<8xf32> to vector<8x1xf32>
    %cst_8 = arith.constant 6.400000e+01 : f32
    %16 = vector.broadcast %cst_8 : f32 to vector<8x1xf32>
    %17 = arith.divf %15, %16 : vector<8x1xf32>
    %18 = arith.mulf %12, %12 : vector<8x1xf32>
    %19 = arith.subf %17, %18 : vector<8x1xf32>
    %20 = vector.broadcast %12 : vector<8x1xf32> to vector<8x64xf32>
    %21 = arith.subf %6, %20 : vector<8x64xf32>
    %cst_9 = arith.constant 9.99999974E-6 : f32
    %22 = vector.broadcast %cst_9 : f32 to vector<8x1xf32>
    %23 = arith.addf %19, %22 : vector<8x1xf32>
    %24 = math.rsqrt %23 : vector<8x1xf32>
    %25 = vector.broadcast %24 : vector<8x1xf32> to vector<8x64xf32>
    %26 = arith.mulf %21, %25 : vector<8x64xf32>
    %27 = vector.broadcast %7 : vector<1x64xf32> to vector<8x64xf32>
    %28 = arith.mulf %26, %27 : vector<8x64xf32>
    %29 = vector.broadcast %8 : vector<1x64xf32> to vector<8x64xf32>
    %30 = arith.addf %28, %29 : vector<8x64xf32>
    %cst_10 = arith.constant 0.000000e+00 : f32
    %31 = vector.broadcast %cst_10 : f32 to vector<8x64xf32>
    %32 = arith.maximumf %30, %31 : vector<8x64xf32>
    %c0_11 = arith.constant 0 : index
    %c0_12 = arith.constant 0 : index
    %33 = vector.load %arg5[%c0_11, %c0_12] : memref<3x64xf32, #tpu.memory_space<vmem>>, vector<3x64xf32>
    %c0_13 = arith.constant 0 : index
    %c0_14 = arith.constant 0 : index
    %34 = vector.load %arg4[%c0_13, %c0_14] : memref<64x64xf32, #tpu.memory_space<vmem>>, vector<64x64xf32>
    %cst_15 = arith.constant dense<0.000000e+00> : vector<8x64xf32>
    %35 = tpu.matmul %32, %34, %cst_15 {dimension_numbers = #tpu.dot_dimension_numbers<[1], [0], [0], [1], [0, 0, 1, 1], [], []>} : vector<8x64xf32>, vector<64x64xf32>, vector<8x64xf32> -> vector<8x64xf32>
    %36 = vector.extract_strided_slice %33 {offsets = [0, 0], sizes = [1, 64], strides = [1, 1]} : vector<3x64xf32> to vector<1x64xf32>
    %37 = vector.broadcast %36 : vector<1x64xf32> to vector<8x64xf32>
    %38 = arith.addf %35, %37 : vector<8x64xf32>
    %39 = vector.extract_strided_slice %33 {offsets = [1, 0], sizes = [1, 64], strides = [1, 1]} : vector<3x64xf32> to vector<1x64xf32>
    %40 = vector.extract_strided_slice %33 {offsets = [2, 0], sizes = [1, 64], strides = [1, 1]} : vector<3x64xf32> to vector<1x64xf32>
    %cst_16 = arith.constant dense<0.000000e+00> : vector<8xf32>
    %41 = vector.multi_reduction <add>, %38, %cst_16 [1] : vector<8x64xf32> to vector<8xf32>
    %42 = vector.shape_cast %41 : vector<8xf32> to vector<8x1xf32>
    %cst_17 = arith.constant 6.400000e+01 : f32
    %43 = vector.broadcast %cst_17 : f32 to vector<8x1xf32>
    %44 = arith.divf %42, %43 : vector<8x1xf32>
    %45 = arith.mulf %38, %38 : vector<8x64xf32>
    %cst_18 = arith.constant dense<0.000000e+00> : vector<8xf32>
    %46 = vector.multi_reduction <add>, %45, %cst_18 [1] : vector<8x64xf32> to vector<8xf32>
    %47 = vector.shape_cast %46 : vector<8xf32> to vector<8x1xf32>
    %cst_19 = arith.constant 6.400000e+01 : f32
    %48 = vector.broadcast %cst_19 : f32 to vector<8x1xf32>
    %49 = arith.divf %47, %48 : vector<8x1xf32>
    %50 = arith.mulf %44, %44 : vector<8x1xf32>
    %51 = arith.subf %49, %50 : vector<8x1xf32>
    %52 = vector.broadcast %44 : vector<8x1xf32> to vector<8x64xf32>
    %53 = arith.subf %38, %52 : vector<8x64xf32>
    %cst_20 = arith.constant 9.99999974E-6 : f32
    %54 = vector.broadcast %cst_20 : f32 to vector<8x1xf32>
    %55 = arith.addf %51, %54 : vector<8x1xf32>
    %56 = math.rsqrt %55 : vector<8x1xf32>
    %57 = vector.broadcast %56 : vector<8x1xf32> to vector<8x64xf32>
    %58 = arith.mulf %53, %57 : vector<8x64xf32>
    %59 = vector.broadcast %39 : vector<1x64xf32> to vector<8x64xf32>
    %60 = arith.mulf %58, %59 : vector<8x64xf32>
    %61 = vector.broadcast %40 : vector<1x64xf32> to vector<8x64xf32>
    %62 = arith.addf %60, %61 : vector<8x64xf32>
    %cst_21 = arith.constant 0.000000e+00 : f32
    %63 = vector.broadcast %cst_21 : f32 to vector<8x64xf32>
    %64 = arith.maximumf %62, %63 : vector<8x64xf32>
    %c0_22 = arith.constant 0 : index
    %c0_23 = arith.constant 0 : index
    %65 = vector.load %arg6[%c0_22, %c0_23] : memref<64x8xf32, #tpu.memory_space<vmem>>, vector<64x8xf32>
    %cst_24 = arith.constant dense<0.000000e+00> : vector<8x8xf32>
    %66 = tpu.matmul %64, %65, %cst_24 {dimension_numbers = #tpu.dot_dimension_numbers<[1], [0], [0], [1], [0, 0, 1, 1], [], []>} : vector<8x64xf32>, vector<64x8xf32>, vector<8x8xf32> -> vector<8x8xf32>
    %c0_25 = arith.constant 0 : index
    %c0_26 = arith.constant 0 : index
    %67 = vector.load %arg7[%c0_25, %c0_26] : memref<1x8xf32, #tpu.memory_space<vmem>>, vector<1x8xf32>
    %68 = vector.broadcast %67 : vector<1x8xf32> to vector<8x8xf32>
    %69 = arith.addf %66, %68 : vector<8x8xf32>
    %70 = math.tanh %69 : vector<8x8xf32>
    %c0_27 = arith.constant 0 : index
    %c0_28 = arith.constant 0 : index
    %71 = vector.load %arg8[%c0_27, %c0_28] : memref<8x8xf32, #tpu.memory_space<vmem>>, vector<8x8xf32>
    tpu.vector_store %arg8[%c0_27, %c0_28], %70 {strides = array<i32>} : memref<8x8xf32, #tpu.memory_space<vmem>>, vector<8x8xf32>,
    return
  }
  func.func @transform_0(%arg0: i32) -> (i32, i32) {
    %c0_i32 = arith.constant 0 : i32
    %c0_i32_0 = arith.constant 0 : i32
    return %arg0, %c0_i32 : i32, i32
  }
  func.func @transform_1(%arg0: i32) -> (i32, i32) {
    %c0_i32 = arith.constant 0 : i32
    %c0_i32_0 = arith.constant 0 : i32
    %c0_i32_1 = arith.constant 0 : i32
    return %c0_i32, %c0_i32_0 : i32, i32
  }
  func.func @transform_2(%arg0: i32) -> (i32, i32) {
    %c0_i32 = arith.constant 0 : i32
    %c0_i32_0 = arith.constant 0 : i32
    %c0_i32_1 = arith.constant 0 : i32
    return %c0_i32, %c0_i32_0 : i32, i32
  }
  func.func @transform_3(%arg0: i32) -> (i32, i32) {
    %c0_i32 = arith.constant 0 : i32
    %c0_i32_0 = arith.constant 0 : i32
    %c0_i32_1 = arith.constant 0 : i32
    return %c0_i32, %c0_i32_0 : i32, i32
  }
  func.func @transform_4(%arg0: i32) -> (i32, i32) {
    %c0_i32 = arith.constant 0 : i32
    %c0_i32_0 = arith.constant 0 : i32
    %c0_i32_1 = arith.constant 0 : i32
    return %c0_i32, %c0_i32_0 : i32, i32
  }
  func.func @transform_5(%arg0: i32) -> (i32, i32) {
    %c0_i32 = arith.constant 0 : i32
    %c0_i32_0 = arith.constant 0 : i32
    %c0_i32_1 = arith.constant 0 : i32
    return %c0_i32, %c0_i32_0 : i32, i32
  }
  func.func @transform_6(%arg0: i32) -> (i32, i32) {
    %c0_i32 = arith.constant 0 : i32
    %c0_i32_0 = arith.constant 0 : i32
    %c0_i32_1 = arith.constant 0 : i32
    return %c0_i32, %c0_i32_0 : i32, i32
  }
  func.func @transform_7(%arg0: i32) -> (i32, i32) {
    %c0_i32 = arith.constant 0 : i32
    %c0_i32_0 = arith.constant 0 : i32
    return %arg0, %c0_i32 : i32, i32
  }
}

</mosaic_0001>

<bundles_post_ra>
// kernel: ddpg_actor_forward.1
= control target key start
LH: loop header
LB: loop body
LE: loop exit
PB: predicated region body
PF: predicated region fallthrough
CT: control target
= control target key end

     0   :  { %12 = vsyncpa [#allocation3], 0  ;;  %s698_s0 = inlined_call_operand.vmem [shape: f32[8,32], index: 0, kind: input, shape index: {}]   ;;  %s699_s1 = inlined_call_operand.vmem [shape: f32[32,64], index: 1, kind: input, shape index: {}]   ;;  %s700_s2 = inlined_call_operand.hbm [shape: f32[3,64], index: 2, kind: input, shape index: {}]   ;;  %s701_s3 = inlined_call_operand.vmem [shape: f32[64,64], index: 3, kind: input, shape index: {}]   ;;  %s702_s4 = inlined_call_operand.hbm [shape: f32[3,64], index: 4, kind: input, shape index: {}]   ;;  %s703_s5 = inlined_call_operand.vmem [shape: f32[64,8], index: 5, kind: input, shape index: {}]   ;;  %s704_s6 = inlined_call_operand.vmem [shape: f32[1,8], index: 6, kind: input, shape index: {}]   ;;  %s705_s7 = inlined_call_operand.vmem [shape: f32[8,8], index: 7, kind: output, shape index: {}]  }
   0x1   :  { %13 = vsyncpa [#allocation5], 0  ;;  %s536_s24 = smov [#allocation2]   ;;  %s537_s26 = smov [#allocation4]  }
   0x2   :  { %s24_s25 = sshll.u32 %s536_s24, 4  ;;  %s36_s27 = sshll.u32 %s537_s26, 4  ;;  %s25_s25 = int_to_ptr.vmem [resolvable:$true] %s24_s25  ;;  %s37_s27 = int_to_ptr.vmem [resolvable:$true] %s36_s27 }
   0x3   :  { %s488_s30 = scalar_lea.hbm %s700_s2, 64 }
   0x4   :  { %p489_p0 = scmp.ne.s32.totalorder %s700_s2, %s488_s30  ;;  %p492_p1 = scmp.lt.u32.totalorder %s488_s30, %s700_s2 }
   0x6   :  { %p494_p2 = pnand %p492_p1, %p489_p0 }
   0x8   :  { %497 = shalt.err (!%p494_p2)
}
   0x9   :  { %s498_s12 = scalar_lea.vmem %s25_s25, 64  ;;  %p503_p4 = scmp.lt.s32.totalorder %s25_s25, %s25_s25 }
   0xa   :  { %p499_p3 = scmp.ne.s32.totalorder %s25_s25, %s498_s12  ;;  %p504_p5 = scmp.lt.s32.totalorder %s498_s12, %s498_s12 }
   0xc   :  { %p505_p6 = por %p504_p5, %p503_p4 }
   0xe   :  { %p506_p7 = pnand %p505_p6, %p499_p3 }
  0x10   :  { %509 = shalt.err (!%p506_p7)
}
  0x11   :  { %27 = dma.hbm_to_vmem [thread:$0]  %s700_s2, 64, %s25_s25, [#allocation3]  }
  0x12   :  { %s510_s17 = scalar_lea.hbm %s702_s4, 64 }
  0x13   :  { %p511_p8 = scmp.ne.s32.totalorder %s702_s4, %s510_s17  ;;  %p514_p9 = scmp.lt.u32.totalorder %s510_s17, %s702_s4 }
  0x15   :  { %p516_p10 = pnand %p514_p9, %p511_p8 }
  0x17   :  { %519 = shalt.err (!%p516_p10)
}
  0x18   :  { %s520_s22 = scalar_lea.vmem %s37_s27, 64  ;;  %p525_p12 = scmp.lt.s32.totalorder %s37_s27, %s37_s27 }
  0x19   :  { %p521_p11 = scmp.ne.s32.totalorder %s37_s27, %s520_s22  ;;  %p526_p13 = scmp.lt.s32.totalorder %s520_s22, %s520_s22 }
  0x1b   :  { %p527_p0 = por %p526_p13, %p525_p12 }
  0x1d   :  { %p528_p1 = pnand %p527_p0, %p521_p11 }
  0x1f   :  { %531 = shalt.err (!%p528_p1)
}
  0x20   :  { %39 = dma.hbm_to_vmem [thread:$0]  %s702_s4, 64, %s37_s27, [#allocation5]  }
  0x21   :  { %532 = dma.done.wait [#allocation3], 64  }
  0x22   :  { %533 = vsyncadd [#allocation3], 4294967232 }
  0x23   :  { %534 = dma.done.wait [#allocation5], 64  }
  0x24   :  { %535 = vsyncadd [#allocation5], 4294967232  ;;  %v538_v0 = vmov 0.0|0.0   ;;  %vm539_vm0 = vmmov 0   ;;  %v540_v1 = vmov 0.0   ;;  %v52_v2 = vld [vmem:[%s699_s1] sm:$0xff]  ;;  %v56_v9 = vlaneseq }
  0x25   :  { %447 = vmatprep.subr.bf16.mxu0 %v538_v0  ;;  %406 = vmatprep.mubr.msk.f32.mxu0 %vm539_vm0, %v540_v1  ;;  %v53_v3 = vld [vmem:[%s699_s1 + $0x8] sm:$0xff]  ;;  %v54_v4 = vld [vmem:[%s699_s1 + $0x10] sm:$0xff]  ;;  %v55_v6 = vld [vmem:[%s699_s1 + $0x18] sm:$0xff]  ;;  %vm60_vm1 = vcmask 261120   ;;  %vm134_vm2 = vcmask 523264   ;;  %vm363_vm3 = vcmask 64512  }
  0x26   :  { %453 = vmatprep.subr.bf16.mxu1 %v538_v0  ;;  %425 = vmatprep.mubr.msk.f32.mxu1 %vm539_vm0, %v540_v1  ;;  %v448_v5 = vpack.c.bf16 %v53_v3, %v52_v2  ;;  %v451_v7 = vpack.c.bf16 %v55_v6, %v54_v4  ;;  %v50_v8 = vld [vmem:[%s698_s0] sm:$0xff]  ;;  %v627_v10 = vshrl.u32 %v56_v9, 7  ;;  %v51_v12 = vld [vmem:[#allocation2] sm:$0x7]  ;;  %v165_v22 = vld [vmem:[%s701_s3 + $0x10] sm:$0xff] }
  0x27   :  { %v163_v20 = vld [vmem:[%s701_s3] sm:$0xff]  ;;  %v164_v21 = vld [vmem:[%s701_s3 + $0x8] sm:$0xff]  ;;  %v166_v24 = vld [vmem:[%s701_s3 + $0x18] sm:$0xff] }
  0x28   :  { %449 = vmatpush3.bf16.msra.mxu0 %v448_v5  ;;  %v58_v11 = vsub.s32 0, %v627_v10  ;;  %v454_v23 = vpack.c.bf16 %v164_v21, %v163_v20  ;;  %v457_v25 = vpack.c.bf16 %v166_v24, %v165_v22  ;;  %v167_v26 = vld [vmem:[%s701_s3 + $0x20] sm:$0xff]  ;;  %v168_v27 = vld [vmem:[%s701_s3 + $0x28] sm:$0xff]  ;;  %v169_v29 = vld [vmem:[%s701_s3 + $0x30] sm:$0xff]  ;;  %v153_v39 = vsub.s32 1, %v627_v10 }
  0x29   :  { %450 = vmatprep.subr.bf16.mxu0 %v538_v0  ;;  %v460_v28 = vpack.c.bf16 %v168_v27, %v167_v26  ;;  %v170_v30 = vld [vmem:[%s701_s3 + $0x38] sm:$0xff]  ;;  %v158_v40 = vsub.s32 2, %v627_v10  ;;  %v162_v49 = vld [vmem:[#allocation4] sm:$0x7]  ;;  %v274_v57 = vld [vmem:[%s703_s5] sm:$0xff] }
  0x2a   :  { %v59_v13 = vrot.slane %v51_v12, %v58_v11  ;;  %455 = vmatpush3.bf16.msra.mxu1 %v454_v23  ;;  %v463_v31 = vpack.c.bf16 %v170_v30, %v169_v29  ;;  %v154_v41 = vrot.slane %v51_v12, %v153_v39  ;;  %v174_v50 = vrot.slane %v162_v49, %v58_v11  ;;  %v275_v58 = vld [vmem:[%s703_s5 + $0x8] sm:$0xff]  ;;  %v276_v60 = vld [vmem:[%s703_s5 + $0x10] sm:$0xff]  ;;  %v277_v61 = vld [vmem:[%s703_s5 + $0x18] sm:$0xff] }
  0x2b   :  { %456 = vmatprep.subr.bf16.mxu1 %v538_v0  ;;  %v159_v44 = vrot.slane %v51_v12, %v158_v40  ;;  %v466_v59 = vpack.c.bf16 %v275_v58, %v274_v57  ;;  %v469_v62 = vpack.c.bf16 %v277_v61, %v276_v60  ;;  %v278_v63 = vld [vmem:[%s703_s5 + $0x20] sm:$0xff]  ;;  %v280_v3 = vld [vmem:[%s703_s5 + $0x30] sm:$0xff]  ;;  %v281_v4 = vld [vmem:[%s703_s5 + $0x38] sm:$0xff] }
  0x2c   :  { %452 = vmatpush3.bf16.msra.mxu0 %v451_v7  ;;  %v475_v5 = vpack.c.bf16 %v281_v4, %v280_v3 }
  0x2d   :  { %465 = vmatprep.subr.bf16.mxu0 %v538_v0 }
  0x2e   :  { %458 = vmatpush3.bf16.msra.mxu1 %v457_v25 }
  0x2f   :  { %407 = vmatmul.mubr.msk.f32.vlgmr.msra.gmra.mrb[0].mxu0 %vm60_vm1, %v50_v8  ;;  %459 = vmatprep.subr.bf16.mxu1 %v538_v0 }
  0x30   :  { %444 = vmatprep.mubr.msk.f32.mxu0 %vm539_vm0, %v540_v1  ;;  %467 = vmatpush3.bf16.msra.mxu0 %v466_v59  ;;  %v279_v1 = vld [vmem:[%s703_s5 + $0x28] sm:$0xff] }
  0x31   :  { %468 = vmatprep.subr.bf16.mxu0 %v538_v0  ;;  %v472_v2 = vpack.c.bf16 %v279_v1, %v278_v63 }
  0x32   :  { %461 = vmatpush3.bf16.msra.mxu1 %v460_v28 }
  0x33   :  { %462 = vmatprep.subr.bf16.mxu1 %v538_v0 }
  0x34   :  { %470 = vmatpush3.bf16.msra.mxu0 %v469_v62 }
  0x35   :  { %471 = vmatprep.subr.bf16.mxu0 %v538_v0 }
  0x36   :  { %464 = vmatpush3.bf16.msra.mxu1 %v463_v31 }
  0x38   :  { %473 = vmatpush3.bf16.msra.mxu0 %v472_v2 }
  0x39   :  { %474 = vmatprep.subr.bf16.mxu0 %v538_v0  ;;  %v373_v0 = vld [vmem:[%s704_s6] ss:$0 sm:$0xff] }
  0x3c   :  { %476 = vmatpush3.bf16.msra.mxu0 %v475_v5 }
 0x102   :  { %v130_v14 = vpop.f32.mrb[0].mxu0 }
 0x103   :  { %v131_v15 = vadd.f32 %v130_v14, %v59_v13  ;;  %v408_v16 = vpop.f32.mrb[1].mxu0  ;;  %v266_v13 = vrot.slane %v162_v49, %v153_v39 }
 0x104   :  { %v271_v16 = vrot.slane %v162_v49, %v158_v40 }
 0x105   :  { %v135_v17 = vsel %vm134_vm2, %v131_v15, 0.0  ;;  %v140_v18 = vmul.f32 %v131_v15, %v131_v15 }
 0x106   :  { %136 = vadd.xlane.f32.xlu0 %v135_v17 }
 0x107   :  { %v141_v19 = vsel %vm134_vm2, %v140_v18, 0.0 }
 0x10a   :  { %142 = vadd.xlane.f32.xlu0 %v141_v19 }
 0x193   :  { %v137_v32 = vpop.xlane.xlu0 %136 }
 0x194   :  { %v139_v33 = vmul.f32 0.015625, %v137_v32 }
 0x196   :  { %v145_v35 = vmul.f32 %v139_v33, %v139_v33  ;;  %v147_v42 = vsub.f32 %v131_v15, %v139_v33 }
 0x197   :  { %v143_v34 = vpop.xlane.xlu0 %142 }
 0x198   :  { %v144_v36 = vmul.f32 0.015625, %v143_v34 }
 0x19a   :  { %v146_v37 = vsub.f32 %v144_v36, %v145_v35 }
 0x19c   :  { %v148_v38 = vadd.f32 1e-05, %v146_v37 }
 0x19e   :  { %482 = vrsqrt.f32 %v148_v38 }
 0x1a8   :  { %v483_v43 = vpop.eup %482 }
 0x1a9   :  { %v150_v45 = vmul.f32 %v483_v43, %v147_v42 }
 0x1ab   :  { %v155_v46 = vmul.f32 %v154_v41, %v150_v45 }
 0x1ad   :  { %v160_v47 = vadd.f32 %v159_v44, %v155_v46 }
 0x1af   :  { %v161_v48 = vmax.f32 %v160_v47, 0.0 }
 0x1b1   :  { %426 = vmatmul.mubr.msk.f32.vlgmr.msra.gmra.mrb[0].mxu1 %vm134_vm2, %v161_v48 }
 0x284   :  { %v244_v51 = vpop.f32.mrb[0].mxu1 }
 0x285   :  { %v245_v52 = vadd.f32 %v244_v51, %v174_v50  ;;  %v427_v53 = vpop.f32.mrb[1].mxu1 }
 0x287   :  { %v248_v54 = vsel %vm134_vm2, %v245_v52, 0.0  ;;  %v252_v55 = vmul.f32 %v245_v52, %v245_v52 }
 0x288   :  { %249 = vadd.xlane.f32.xlu1 %v248_v54 }
 0x289   :  { %v253_v56 = vsel %vm134_vm2, %v252_v55, 0.0 }
 0x28c   :  { %254 = vadd.xlane.f32.xlu1 %v253_v56 }
 0x315   :  { %v250_v6 = vpop.xlane.xlu1 %249 }
 0x316   :  { %v251_v7 = vmul.f32 0.015625, %v250_v6 }
 0x318   :  { %v257_v9 = vmul.f32 %v251_v7, %v251_v7  ;;  %v259_v14 = vsub.f32 %v245_v52, %v251_v7 }
 0x319   :  { %v255_v8 = vpop.xlane.xlu1 %254 }
 0x31a   :  { %v256_v10 = vmul.f32 0.015625, %v255_v8 }
 0x31c   :  { %v258_v11 = vsub.f32 %v256_v10, %v257_v9 }
 0x31e   :  { %v260_v12 = vadd.f32 1e-05, %v258_v11 }
 0x320   :  { %484 = vrsqrt.f32 %v260_v12 }
 0x32a   :  { %v485_v15 = vpop.eup %484 }
 0x32b   :  { %v262_v17 = vmul.f32 %v485_v15, %v259_v14 }
 0x32d   :  { %v267_v18 = vmul.f32 %v266_v13, %v262_v17 }
 0x32f   :  { %v272_v19 = vadd.f32 %v271_v16, %v267_v18 }
 0x331   :  { %v273_v20 = vmax.f32 %v272_v19, 0.0 }
 0x333   :  { %445 = vmatmul.mubr.msk.f32.vlgmr.msra.gmra.mrb[2].mxu0 %vm134_vm2, %v273_v20 }
 0x406   :  { %v358_v21 = vpop.f32.mrb[2].mxu0 }
 0x407   :  { %v359_v22 = vadd.f32 %v373_v0, %v358_v21  ;;  %v446_v23 = vpop.f32.mrb[3].mxu0 }
 0x409   :  { %486 = vtanh.f32 %v359_v22 }
 0x413   :  { %v487_v24 = vpop.eup %486 }
 0x414   :  { %364 = vst.msk [vmem:[%s705_s7] sm:$0xff] %vm363_vm3, %v487_v24 }
 0x415   :  { %369 = vsyncpa [#allocation3], 1 }
 0x416   :  { %370 = vsyncpa [#allocation5], 1 }

</bundles_post_ra>
